<compile_context>
chip_gen: v7x
topology: tpu7x:2x2x1
jax: 0.10.0
libtpu: 0.0.40
codegen_flags: <defaults>
</compile_context>

<pallas_src>
import math

import jax
import jax.numpy as jnp
from jax import lax
from jax.experimental import pallas as pl
from jax.experimental.pallas import tpu as pltpu


def _round_up(x: int, n: int) -> int:
    return ((x + n - 1) // n) * n


def _make_arcmargin_kernel(s: float, m: float, tile_c: int):
    cos_m = math.cos(m)
    sin_m = math.sin(m)
    th = math.cos(math.pi - m)
    mm = math.sin(math.pi - m) * m

    def kernel(has_ref, xn_ref, wn_ref, lbl_ref, o_ref):
        # Grid: axis 0 = class tile (leading, megacore-sharded), axis 1 = batch tile.
        j = pl.program_id(0)          # class-tile index
        i = pl.program_id(1)          # batch-tile index
        nb = pl.num_programs(1)

        # cosine = xn @ wn.T  -> [TB, TC] on the MXU with f32 accumulation.
        # Both operands arrive already L2-normalized and cast by the wrapper.
        cosine = lax.dot_general(
            xn_ref[...], wn_ref[...],
            dimension_numbers=(((1,), (1,)), ((), ())),
            preferred_element_type=jnp.float32,
        )

        has_label = has_ref[j * nb + i]   # scalar i32 from SMEM (prefetched)

        # Fast path: no sample in this batch tile has its label in this class
        # tile -> the whole output block is just scaled cosine.
        @pl.when(has_label == 0)
        def _():
            o_ref[...] = (cosine * s).astype(o_ref.dtype)

        # Slow path: margin math, restricted to the label column only.
        @pl.when(has_label != 0)
        def _():
            lbl = lbl_ref[...]                                   # [TB, 1] int32
            tb, tc = cosine.shape
            # GLOBAL column index = tile offset + lane iota (key point when C is tiled).
            col = j * tile_c + lax.broadcasted_iota(jnp.int32, (tb, tc), 1)
            is_lbl = col == lbl                                  # [TB, TC]

            # cosine at the label column (0 for rows whose label lies elsewhere;
            # those rows never select phi below, so the value is irrelevant).
            cos_l = jnp.sum(jnp.where(is_lbl, cosine, 0.0),
                            axis=-1, keepdims=True)              # [TB, 1]
            sine_l = jnp.sqrt(jnp.maximum(1.0 - cos_l * cos_l, 0.0))
            phi_l = cos_l * cos_m - sine_l * sin_m
            phi_l = jnp.where(cos_l > th, phi_l, cos_l - mm)     # [TB, 1]

            o_ref[...] = (jnp.where(is_lbl, phi_l, cosine) * s).astype(o_ref.dtype)

    return kernel


def arc_margin_product(x, weight, label, *, s=32.0, m=0.5,
                       tile_b=256, tile_c=1024,
                       operand_dtype=jnp.bfloat16):
    """ArcFace forward.

    x: [B, in_features], weight: [out_features, in_features], label: [B] int.
    Returns [B, out_features] float32 = s * (margin-adjusted cosine).

    operand_dtype: dtype of the MXU operands.  bfloat16 (default) for
    production throughput / halved DMA; float32 for strict (1e-4) accuracy.
    """
    B, D = x.shape
    C, D2 = weight.shape
    assert D == D2, "feature dims of x and weight must match"

    # ---- tile selection (D is never padded: it stays whole in every block,
    # and a block dim equal to the full array dim is always legal). ----
    if B <= tile_b:
        TB, Bp = B, B                       # single batch block, no padding
    else:
        assert tile_b % 8 == 0, "tile_b must be a multiple of 8"
        TB = tile_b
        Bp = _round_up(B, TB)
    if C <= tile_c:
        TC, Cp = C, C                       # single class block, no padding
    else:
        assert tile_c % 128 == 0, "tile_c must be a multiple of 128"
        TC = tile_c
        Cp = _round_up(C, TC)

    nb = Bp // TB
    nc = Cp // TC

    # ---- normalize ONCE in the wrapper (one fused pass each), then cast to
    # the MXU operand dtype.  Matches F.normalize: v / max(||v||_2, 1e-12).
    # NOTE: in a real training loop, normalize/cast/pad the weight once per
    # step outside this call instead of per invocation. ----
    xf = x.astype(jnp.float32)
    xn = xf / jnp.maximum(jnp.linalg.norm(xf, axis=1, keepdims=True), 1e-12)
    wf = weight.astype(jnp.float32)
    wn = wf / jnp.maximum(jnp.linalg.norm(wf, axis=1, keepdims=True), 1e-12)

    xn_op = xn.astype(operand_dtype)
    wn_op = wn.astype(operand_dtype)
    label = label.astype(jnp.int32)

    # ---- pad only the axes that are actually tiled. ----
    if Bp != B:
        xn_op = jnp.zeros((Bp, D), operand_dtype).at[:B].set(xn_op)
        lbl_p = jnp.full((Bp, 1), -1, jnp.int32).at[:B, 0].set(label)
    else:
        lbl_p = label.reshape(B, 1)
    if Cp != C:
        wn_op = jnp.zeros((Cp, D), operand_dtype).at[:C].set(wn_op)

    # ---- per-(class-tile, batch-tile) "contains a label" table, scalar-
    # prefetched into SMEM so the kernel can pl.when-skip the margin path. ----
    b_tile = jnp.arange(B, dtype=jnp.int32) // TB
    c_tile = label // TC
    has = jnp.zeros((nc, nb), jnp.int32).at[c_tile, b_tile].set(1)
    has_flat = has.reshape(-1)              # index with j * nb + i

    grid = (nc, nb)                         # class axis leading (megacore shards classes)

    # ---- VMEM budget: double-buffered x/w/label/output tiles + headroom,
    # capped at 48 MiB (25% headroom on v7x's 64 MiB physical VMEM). ----
    bpe = jnp.dtype(operand_dtype).itemsize
    tile_bytes = 2 * (TB * D * bpe + TC * D * bpe + TB * 4 + TB * TC * 4)
    vmem_limit = int(min(max(2 * tile_bytes, 32 * 1024 * 1024), 48 * 1024 * 1024))

    cost = pl.CostEstimate(
        flops=2 * B * C * D,
        transcendentals=B,                                  # sqrt on label column only
        bytes_accessed=bpe * (nc * Bp * D + Cp * D) + 4 * Bp * Cp + 4 * Bp,
    )

    kernel = _make_arcmargin_kernel(s, m, TC)
    out = pl.pallas_call(
        kernel,
        out_shape=jax.ShapeDtypeStruct((Bp, Cp), jnp.float32),
        grid_spec=pltpu.PrefetchScalarGridSpec(
            num_scalar_prefetch=1,                          # has_flat -> SMEM
            grid=grid,
            in_specs=[
                pl.BlockSpec((TB, D), lambda j, i, has: (i, 0)),   # normalized x
                pl.BlockSpec((TC, D), lambda j, i, has: (j, 0)),   # normalized weight
                pl.BlockSpec((TB, 1), lambda j, i, has: (i, 0)),   # labels
            ],
            out_specs=pl.BlockSpec((TB, TC), lambda j, i, has: (i, j)),
        ),
        compiler_params=pltpu.CompilerParams(
            dimension_semantics=("parallel", "parallel"),
            vmem_limit_bytes=vmem_limit,
        ),
        cost_estimate=cost,
    )(has_flat, xn_op, wn_op, lbl_p)

    if Bp != B or Cp != C:
        out = out[:B, :C]
    return out


def _reference(x, weight, label, *, s=32.0, m=0.5):
    # Pure-JAX reference mirroring the PyTorch forward (easy_margin=False).
    eps = 1e-12
    xn = x / jnp.maximum(jnp.linalg.norm(x, axis=1, keepdims=True), eps)
    wn = weight / jnp.maximum(jnp.linalg.norm(weight, axis=1, keepdims=True), eps)
    cosine = xn @ wn.T
    sine = jnp.sqrt(jnp.clip(1.0 - cosine ** 2, 0.0, 1.0))
    phi = cosine * math.cos(m) - sine * math.sin(m)
    phi = jnp.where(cosine > math.cos(math.pi - m), phi,
                    cosine - math.sin(math.pi - m) * m)
    one_hot = jax.nn.one_hot(label, cosine.shape[1], dtype=cosine.dtype)
    return (one_hot * phi + (1.0 - one_hot) * cosine) * s


if __name__ == "__main__":
    B, in_features, out_features = 8, 64, 128
    s_param, m_param = 32.0, 0.5

    key = jax.random.PRNGKey(0)
    kx, kw, kl = jax.random.split(key, 3)

    x = jax.random.normal(kx, (B, in_features), dtype=jnp.float32)

    # Deterministic xavier_uniform_ init for weight [out_features, in_features].
    bound = math.sqrt(6.0 / (in_features + out_features))
    weight = jax.random.uniform(
        kw, (out_features, in_features), dtype=jnp.float32,
        minval=-bound, maxval=bound)

    label = jax.random.randint(kl, (B,), 0, out_features, dtype=jnp.int32)

    ref = _reference(x, weight, label, s=s_param, m=m_param)

    # Strict-accuracy path (f32 MXU operands): must match reference to 1e-4.
    out_f32 = arc_margin_product(x, weight, label, s=s_param, m=m_param,
                                 operand_dtype=jnp.float32)
    out_f32 = jax.block_until_ready(out_f32)
    assert out_f32.shape == (B, out_features)
    assert jnp.allclose(out_f32, ref, atol=1e-4, rtol=1e-4), "f32 mismatch vs reference"

    # Production path (default bf16 MXU operands): looser tolerance by design.
    out_bf16 = arc_margin_product(x, weight, label, s=s_param, m=m_param)
    out_bf16 = jax.block_until_ready(out_bf16)
    assert out_bf16.shape == (B, out_features)
    assert jnp.all(jnp.isfinite(out_bf16))
    assert jnp.allclose(out_bf16, ref, atol=0.25), "bf16 path outside expected tolerance"

    print("KERNEL_OK")
</pallas_src>

<mosaic_0001>
module attributes {stable_mosaic.version = 11 : i64} {
  func.func @kernel(%arg0: i32, %arg1: i32, %arg2: memref<1xi32, #tpu.memory_space<smem>>, %arg3: memref<8x64xf32, #tpu.memory_space<vmem>>, %arg4: memref<128x64xf32, #tpu.memory_space<vmem>>, %arg5: memref<8x1xi32, #tpu.memory_space<vmem>>, %arg6: memref<8x128xf32, #tpu.memory_space<vmem>>) attributes {dimension_semantics = [#tpu.dimension_semantics<parallel>, #tpu.dimension_semantics<parallel>], iteration_bounds = array<i64: 1, 1>, scalar_prefetch = 1 : i64, scratch_operands = 0 : i64, tpu.core_type = #tpu.core_type<tc>, window_params = [{transform_indices = @transform_0, window_bounds = array<i64: 8, 64>}, {transform_indices = @transform_1, window_bounds = array<i64: 128, 64>}, {transform_indices = @transform_2, window_bounds = array<i64: 8, 1>}, {transform_indices = @transform_3, window_bounds = array<i64: 8, 128>}]} {
    %c0 = arith.constant 0 : index
    %c0_0 = arith.constant 0 : index
    %0 = vector.load %arg3[%c0, %c0_0] : memref<8x64xf32, #tpu.memory_space<vmem>>, vector<8x64xf32>
    %c0_1 = arith.constant 0 : index
    %c0_2 = arith.constant 0 : index
    %1 = vector.load %arg4[%c0_1, %c0_2] : memref<128x64xf32, #tpu.memory_space<vmem>>, vector<128x64xf32>
    %cst = arith.constant dense<0.000000e+00> : vector<8x128xf32>
    %2 = tpu.matmul %0, %1, %cst {dimension_numbers = #tpu.dot_dimension_numbers<[1], [1], [0], [0], [0, 0, 1, 0], [], []>} : vector<8x64xf32>, vector<128x64xf32>, vector<8x128xf32> -> vector<8x128xf32>
    %c1_i32 = arith.constant 1 : i32
    %3 = arith.muli %arg0, %c1_i32 : i32
    %4 = arith.addi %3, %arg1 : i32
    %5 = arith.index_cast %4 : i32 to index
    %6 = memref.load %arg2[%5] : memref<1xi32, #tpu.memory_space<smem>>
    %c0_i32 = arith.constant 0 : i32
    %7 = arith.cmpi eq, %6, %c0_i32 : i32
    %8 = arith.extui %7 : i1 to i32
    %c0_i32_3 = arith.constant 0 : i32
    %9 = arith.cmpi ne, %8, %c0_i32_3 : i32
    scf.if %9 {
      %cst_6 = arith.constant 3.200000e+01 : f32
      %13 = vector.broadcast %cst_6 : f32 to vector<8x128xf32>
      %14 = arith.mulf %2, %13 : vector<8x128xf32>
      %c0_7 = arith.constant 0 : index
      %c0_8 = arith.constant 0 : index
      %15 = vector.load %arg6[%c0_7, %c0_8] : memref<8x128xf32, #tpu.memory_space<vmem>>, vector<8x128xf32>
      tpu.vector_store %arg6[%c0_7, %c0_8], %14 {strides = array<i32>} : memref<8x128xf32, #tpu.memory_space<vmem>>, vector<8x128xf32>,
    } else {
    }
    %c0_i32_4 = arith.constant 0 : i32
    %10 = arith.cmpi ne, %6, %c0_i32_4 : i32
    %11 = arith.extui %10 : i1 to i32
    %c0_i32_5 = arith.constant 0 : i32
    %12 = arith.cmpi ne, %11, %c0_i32_5 : i32
    scf.if %12 {
      %c0_6 = arith.constant 0 : index
      %c0_7 = arith.constant 0 : index
      %13 = vector.load %arg5[%c0_6, %c0_7] : memref<8x1xi32, #tpu.memory_space<vmem>>, vector<8x1xi32>
      %c128_i32 = arith.constant 128 : i32
      %14 = arith.muli %arg0, %c128_i32 : i32
      %15 = tpu.iota {dimensions = array<i32: 1>} : vector<8x128xi32>
      %16 = vector.broadcast %14 : i32 to vector<8x128xi32>
      %17 = arith.addi %16, %15 : vector<8x128xi32>
      %18 = vector.broadcast %13 : vector<8x1xi32> to vector<8x128xi32>
      %19 = arith.cmpi eq, %17, %18 : vector<8x128xi32>
      %cst_8 = arith.constant 0.000000e+00 : f32
      %20 = vector.broadcast %cst_8 : f32 to vector<8x128xf32>
      %21 = arith.select %19, %2, %20 : vector<8x128xi1>, vector<8x128xf32>
      %cst_9 = arith.constant dense<0.000000e+00> : vector<8xf32>
      %22 = vector.multi_reduction <add>, %21, %cst_9 [1] : vector<8x128xf32> to vector<8xf32>
      %23 = vector.shape_cast %22 : vector<8xf32> to vector<8x1xf32>
      %24 = arith.mulf %23, %23 : vector<8x1xf32>
      %cst_10 = arith.constant 1.000000e+00 : f32
      %25 = vector.broadcast %cst_10 : f32 to vector<8x1xf32>
      %26 = arith.subf %25, %24 : vector<8x1xf32>
      %cst_11 = arith.constant 0.000000e+00 : f32
      %27 = vector.broadcast %cst_11 : f32 to vector<8x1xf32>
      %28 = arith.maximumf %26, %27 : vector<8x1xf32>
      %29 = math.sqrt %28 : vector<8x1xf32>
      %cst_12 = arith.constant 0.87758255 : f32
      %30 = vector.broadcast %cst_12 : f32 to vector<8x1xf32>
      %31 = arith.mulf %23, %30 : vector<8x1xf32>
      %cst_13 = arith.constant 0.47942555 : f32
      %32 = vector.broadcast %cst_13 : f32 to vector<8x1xf32>
      %33 = arith.mulf %29, %32 : vector<8x1xf32>
      %34 = arith.subf %31, %33 : vector<8x1xf32>
      %cst_14 = arith.constant -0.87758255 : f32
      %35 = vector.broadcast %cst_14 : f32 to vector<8x1xf32>
      %36 = arith.cmpf ogt, %23, %35 : vector<8x1xf32>
      %cst_15 = arith.constant 0.239712775 : f32
      %37 = vector.broadcast %cst_15 : f32 to vector<8x1xf32>
      %38 = arith.subf %23, %37 : vector<8x1xf32>
      %39 = arith.select %36, %34, %38 : vector<8x1xi1>, vector<8x1xf32>
      %40 = vector.shape_cast %39 : vector<8x1xf32> to vector<8x1xf32>
      %41 = vector.broadcast %40 : vector<8x1xf32> to vector<8x128xf32>
      %42 = arith.select %19, %41, %2 : vector<8x128xi1>, vector<8x128xf32>
      %cst_16 = arith.constant 3.200000e+01 : f32
      %43 = vector.broadcast %cst_16 : f32 to vector<8x128xf32>
      %44 = arith.mulf %42, %43 : vector<8x128xf32>
      %c0_17 = arith.constant 0 : index
      %c0_18 = arith.constant 0 : index
      %45 = vector.load %arg6[%c0_17, %c0_18] : memref<8x128xf32, #tpu.memory_space<vmem>>, vector<8x128xf32>
      tpu.vector_store %arg6[%c0_17, %c0_18], %44 {strides = array<i32>} : memref<8x128xf32, #tpu.memory_space<vmem>>, vector<8x128xf32>,
    } else {
    }
    return
  }
  func.func @transform_0(%arg0: i32, %arg1: i32, %arg2: memref<1xi32, #tpu.memory_space<smem>>) -> (i32, i32) {
    %c0_i32 = arith.constant 0 : i32
    %c0_i32_0 = arith.constant 0 : i32
    return %arg1, %c0_i32 : i32, i32
  }
  func.func @transform_1(%arg0: i32, %arg1: i32, %arg2: memref<1xi32, #tpu.memory_space<smem>>) -> (i32, i32) {
    %c0_i32 = arith.constant 0 : i32
    %c0_i32_0 = arith.constant 0 : i32
    return %arg0, %c0_i32 : i32, i32
  }
  func.func @transform_2(%arg0: i32, %arg1: i32, %arg2: memref<1xi32, #tpu.memory_space<smem>>) -> (i32, i32) {
    %c0_i32 = arith.constant 0 : i32
    %c0_i32_0 = arith.constant 0 : i32
    return %arg1, %c0_i32 : i32, i32
  }
  func.func @transform_3(%arg0: i32, %arg1: i32, %arg2: memref<1xi32, #tpu.memory_space<smem>>) -> (i32, i32) {
    %c0_i32 = arith.constant 0 : i32
    return %arg1, %arg0 : i32, i32
  }
}

</mosaic_0001>

<bundles_post_ra>
// kernel: tpu_custom_call.1
= control target key start
LH: loop header
LB: loop body
LE: loop exit
PB: predicated region body
PF: predicated region fallthrough
CT: control target
= control target key end

     0   :  { %10 = vsyncpa [#allocation5], 0  ;;  %vm34_vm0 = vcmask 523264   ;;  %v350_v2 = vmov 0.0|0.0   ;;  %vm351_vm2 = vmmov 0   ;;  %v352_v5 = vmov 0.0   ;;  %s477_s0 = inlined_call_operand.<no memory space> [shape: s32[1], index: 0, kind: input, shape index: {}]   ;;  %s478_s1 = inlined_call_operand.vmem [shape: f32[8,64], index: 1, kind: input, shape index: {}]   ;;  %s479_s2 = inlined_call_operand.vmem [shape: f32[128,64], index: 2, kind: input, shape index: {}]   ;;  %s480_s3 = inlined_call_operand.vmem [shape: s32[8,1], index: 3, kind: input, shape index: {}]   ;;  %s481_s4 = inlined_call_operand.hbm [shape: f32[8,128], index: 4, kind: output, shape index: {}]  }
   0x1   :  { %v18_v0 = vld [vmem:[%s479_s2] sm:$0xff]  ;;  %v19_v1 = vld [vmem:[%s479_s2 + $0x8] sm:$0xff]  ;;  %286 = vmatprep.subr.bf16.mxu0 %v350_v2  ;;  %vm388_vm1 = vmpackc.low %vm34_vm0, %vm34_vm0  ;;  %283 = vmatprep.mubr.msk.f32.mxu0 %vm351_vm2, %v352_v5  ;;  %p231_p0 = scmp.ne.s32.totalorder %s477_s0, 0 }
   0x2   :  { %v287_v3 = vpack.c.bf16 %v19_v1, %v18_v0  ;;  %v20_v6 = vld [vmem:[%s479_s2 + $0x10] sm:$0xff]  ;;  %v21_v7 = vld [vmem:[%s479_s2 + $0x18] sm:$0xff]  ;;  %v22_v9 = vld [vmem:[%s479_s2 + $0x20] sm:$0xff] }
   0x3   :  { %v291_v8 = vpack.c.bf16 %v21_v7, %v20_v6  ;;  %v23_v10 = vld [vmem:[%s479_s2 + $0x28] sm:$0xff]  ;;  %v24_v12 = vld [vmem:[%s479_s2 + $0x30] sm:$0xff]  ;;  %v25_v13 = vld [vmem:[%s479_s2 + $0x38] sm:$0xff] }
   0x4   :  { %289 = vmatpush3.bf16.xpose.msk.msra.mxu0 %vm388_vm1, %v287_v3  ;;  %v295_v11 = vpack.c.bf16 %v23_v10, %v22_v9  ;;  %v299_v14 = vpack.c.bf16 %v25_v13, %v24_v12  ;;  %v26_v15 = vld [vmem:[%s479_s2 + $0x40] sm:$0xff]  ;;  %v27_v16 = vld [vmem:[%s479_s2 + $0x48] sm:$0xff]  ;;  %v28_v18 = vld [vmem:[%s479_s2 + $0x50] sm:$0xff] }
   0x5   :  { %290 = vmatprep.subr.bf16.mxu0 %v350_v2  ;;  %v303_v17 = vpack.c.bf16 %v27_v16, %v26_v15  ;;  %v29_v19 = vld [vmem:[%s479_s2 + $0x58] sm:$0xff]  ;;  %v30_v21 = vld [vmem:[%s479_s2 + $0x60] sm:$0xff]  ;;  %v31_v22 = vld [vmem:[%s479_s2 + $0x68] sm:$0xff] }
   0x6   :  { %v307_v20 = vpack.c.bf16 %v29_v19, %v28_v18  ;;  %v311_v23 = vpack.c.bf16 %v31_v22, %v30_v21  ;;  %v32_v24 = vld [vmem:[%s479_s2 + $0x70] sm:$0xff]  ;;  %v33_v25 = vld [vmem:[%s479_s2 + $0x78] sm:$0xff]  ;;  %v17_v27 = vld [vmem:[%s478_s1] sm:$0xff] }
   0x7   :  { %v315_v26 = vpack.c.bf16 %v33_v25, %v32_v24 }
   0xc   :  { %293 = vmatpush3.bf16.xpose.msk.msra.mxu0 %vm388_vm1, %v291_v8 }
   0xd   :  { %294 = vmatprep.subr.bf16.mxu0 %v350_v2 }
  0x14   :  { %297 = vmatpush3.bf16.xpose.msk.msra.mxu0 %vm388_vm1, %v295_v11 }
  0x15   :  { %298 = vmatprep.subr.bf16.mxu0 %v350_v2 }
  0x1c   :  { %301 = vmatpush3.bf16.xpose.msk.msra.mxu0 %vm388_vm1, %v299_v14 }
  0x1d   :  { %302 = vmatprep.subr.bf16.mxu0 %v350_v2 }
  0x24   :  { %305 = vmatpush3.bf16.xpose.msk.msra.mxu0 %vm388_vm1, %v303_v17 }
  0x25   :  { %306 = vmatprep.subr.bf16.mxu0 %v350_v2 }
  0x2c   :  { %309 = vmatpush3.bf16.xpose.msk.msra.mxu0 %vm388_vm1, %v307_v20 }
  0x2d   :  { %310 = vmatprep.subr.bf16.mxu0 %v350_v2 }
  0x34   :  { %313 = vmatpush3.bf16.xpose.msk.msra.mxu0 %vm388_vm1, %v311_v23 }
  0x35   :  { %314 = vmatprep.subr.bf16.mxu0 %v350_v2 }
  0x3c   :  { %317 = vmatpush3.bf16.xpose.msk.msra.mxu0 %vm388_vm1, %v315_v26 }
  0x43   :  { %284 = vmatmul.mubr.msk.f32.vlgmr.msra.gmra.mrb[0].mxu0 %vm34_vm0, %v17_v27 }
 0x111   :  { %161 = sbr.rel (%p231_p0) target bundleno = 282 (0x11a), region = 17 }
 0x116   :  { %v152_v28 = vpop.f32.mrb[0].mxu0 }
 0x117   :  { %v285_v29 = vpop.f32.mrb[1].mxu0  ;;  %v162_v30 = vmul.f32 (!%p231_p0), 32.0, %v152_v28 }
 0x119   :  { %163 = vst [vmem:[#allocation4] sm:$0xff] %v162_v30 }
 0x11a PF:  { %p232_p1 = scmp.eq.s32.totalorder %s477_s0, 0 }
 0x11b   :  { %v168_v31 = vld [vmem:[%s480_s3] sm:$0xff] (!%p232_p1)  ;;  %v353_v32 = vmov (!%p232_p1), 0   ;;  %v170_v33 = vlaneseq (!%p232_p1) }
 0x11c   :  { %167 = sbr.rel (%p232_p1) target bundleno = 587 (0x24b), region = 21  ;;  %323 = vset.pattern.permute.xlu0 (!%p232_p1), %v353_v32 }
 0x11d   :  { %175 = vperm.xlu0 (!%p232_p1), %323, %v168_v31   ;;  %v171_v34 = vand.u32 (!%p232_p1), 127, %v170_v33 }
 0x19c   :  { %v176_v35 = vpop.permute.xlu0 %175 }
 0x19d   :  { %vm177_vm3 = vcmp.eq.s32.totalorder %v171_v34, %v176_v35 }
 0x19e   :  { %v178_v36 = vsel %vm177_vm3, %v152_v28, 0.0 }
 0x19f   :  { %179 = vadd.xlane.f32.xlu0 %v178_v36 }
 0x22c   :  { %v180_v37 = vpop.xlane.xlu0 %179 }
 0x22d   :  { %v181_v38 = vmul.f32 %v180_v37, %v180_v37  ;;  %v191_v46 = vmul.f32 0.87758255, %v180_v37  ;;  %v233_v49 = vadd.f32 -0.23971277, %v180_v37  ;;  %vm194_vm6 = vcmp.gt.f32.partialorder %v180_v37, -0.87758255 }
 0x22f   :  { %v182_v39 = vsub.f32 1.0, %v181_v38 }
 0x231   :  { %v183_v40 = vmax.f32 %v182_v39, 0.0 }
 0x233   :  { %324 = vrsqrt.f32 %v183_v40  ;;  %vm186_vm4 = vcmp.eq.f32.partialorder %v183_v40, inf  ;;  %v189_v43 = vand.u32 2147483648, %v183_v40  ;;  %vm188_vm5 = vcmp.eq.f32.partialorder %v183_v40, 0.0 }
 0x23d   :  { %v325_v41 = vpop.eup %324 }
 0x23e   :  { %v185_v42 = vmul.f32 %v325_v41, %v183_v40 }
 0x240   :  { %v187_v44 = vsel %vm186_vm4, %v183_v40, %v185_v42 }
 0x241   :  { %v190_v45 = vsel %vm188_vm5, %v189_v43, %v187_v44 }
 0x242   :  { %v192_v47 = vmul.f32 0.47942555, %v190_v45 }
 0x244   :  { %v193_v48 = vsub.f32 %v191_v46, %v192_v47 }
 0x246   :  { %v196_v50 = vsel %vm194_vm6, %v193_v48, %v233_v49 }
 0x247   :  { %v197_v51 = vsel %vm177_vm3, %v196_v50, %v152_v28 }
 0x248   :  { %v198_v52 = vmul.f32 32.0, %v197_v51 }
 0x24a   :  { %199 = vst [vmem:[#allocation4] sm:$0xff] %v198_v52 }
 0x24b PF:  { %s354_s0 = smov [#allocation4]  }
 0x24c   :  { %s206_s1 = sshll.u32 %s354_s0, 4  ;;  %s207_s1 = int_to_ptr.vmem [resolvable:$true] %s206_s1 }
 0x24d   :  { %s326_s3 = scalar_lea.vmem %s207_s1, 128  ;;  %p331_p3 = scmp.lt.s32.totalorder %s207_s1, %s207_s1 }
 0x24e   :  { %p327_p2 = scmp.ne.s32.totalorder %s207_s1, %s326_s3  ;;  %p332_p4 = scmp.lt.s32.totalorder %s326_s3, %s326_s3 }
 0x250   :  { %p333_p5 = por %p332_p4, %p331_p3 }
 0x252   :  { %p334_p6 = pnand %p333_p5, %p327_p2 }
 0x254   :  { %337 = shalt.err (!%p334_p6)
}
 0x255   :  { %s338_s30 = scalar_lea.hbm %s481_s4, 128 }
 0x256   :  { %p339_p7 = scmp.ne.s32.totalorder %s481_s4, %s338_s30  ;;  %p342_p8 = scmp.lt.u32.totalorder %s338_s30, %s481_s4 }
 0x258   :  { %p344_p9 = pnand %p342_p8, %p339_p7 }
 0x25a   :  { %347 = shalt.err (!%p344_p9)
}
 0x25b   :  { %209 = dma.vmem_to_hbm [thread:$0]  %s207_s1, 128, %s481_s4, [#allocation5]  }
 0x25c   :  { %348 = dma.done.wait [#allocation5], 128  }
 0x25d   :  { %349 = vsyncadd [#allocation5], 4294967168 }
 0x25e   :  { %213 = vsyncpa [#allocation5], 1 }

</bundles_post_ra>
